<compile_context>
chip_gen: v7x
topology: tpu7x:2x2x1
jax: 0.10.0
libtpu: 0.0.40
codegen_flags: <defaults>
</compile_context>

<pallas_src>
import math

import jax
import jax.numpy as jnp
import numpy as np
from jax import lax
from jax.experimental import pallas as pl
from jax.experimental.pallas import tpu as pltpu


def _cdiv(a, b):
    return -(-a // b)


def _scale_shift_kernel(x_ref, ss_ref, o_ref):
    # Fused eval-mode BN + channel gating: one FMA per element.
    # x is loaded in its native dtype and upcast in vregs; the result is
    # stored back in the caller's dtype (no extra wrapper-side cast passes).
    x = x_ref[...].astype(jnp.float32)
    scale = ss_ref[:, 0:1]          # (block_rows, 1) -> lane broadcast
    shift = ss_ref[:, 1:2]
    o_ref[...] = (x * scale + shift).astype(o_ref.dtype)


def _conv1d_same(vec, w, pad):
    """PyTorch Conv1d(1,1,ks,padding=pad,bias=False): cross-correlation with
    zero padding, expressed as ks shifted adds (ks is tiny)."""
    C = vec.shape[0]
    ks = w.shape[0]
    vp = jnp.pad(vec, (pad, pad))
    out = jnp.zeros((C,), vec.dtype)
    for k in range(ks):
        out = out + w[k] * lax.dynamic_slice(vp, (k,), (C,))
    return out


def _vmem_budget_bytes():
    """Scoped-VMEM budget derived from the chip's physical VMEM
    (64 MiB/TC on v7x, 128 MiB on v5e/v6e); conservative fallback."""
    try:
        info = pltpu.get_tpu_info()
        phys = int(getattr(info, "vmem_capacity_bytes", 64 << 20))
    except Exception:
        phys = 64 << 20
    return min(phys // 2, 64 << 20)


def _pick_tiles(R, HW, bytes_per_elem, vmem_budget):
    """Block sizes for the (R, HW) streaming pass."""
    per_elem = 2 * bytes_per_elem            # input block + output block
    # Per-tile byte target: double-buffered in+out plus the lane-padded
    # (rows, 2) scale/shift buffers must stay well inside `vmem_budget`.
    target = max(1 << 20, min(8 << 20, vmem_budget // 5))

    # Lane axis: keep the full H*W when it fits (lane-dense, single col tile);
    # otherwise tile it in multiples of 128 on a second grid axis.
    col_cap = max(128, target // (8 * per_elem))
    block_cols = HW if HW <= col_cap else 128 * max(1, col_cap // 128)
    n_col = _cdiv(HW, block_cols)

    # Sublane axis.
    if R <= 8:
        return R, block_cols
    rows_fit = max(8, (target // (block_cols * per_elem)) // 8 * 8)
    # Never let the row axis collapse to one step: >= 2 row tiles keep both
    # v7x TensorCores busy on this ("parallel","parallel") grid.
    half_rows = 8 * _cdiv(_cdiv(R, 2), 8)
    block_rows = min(rows_fit, half_rows)

    # Light preference for an even total step count (v7x core balance).
    if (_cdiv(R, block_rows) * n_col) % 2 == 1:
        base_tiles = _cdiv(R, block_rows)
        for extra in (1, 2, 3):
            cand = max(8, 8 * _cdiv(_cdiv(R, base_tiles + extra), 8))
            if (_cdiv(R, cand) * n_col) % 2 == 0:
                block_rows = cand
                break
    return block_rows, block_cols


@jax.jit
def newbn_varonly_eval(x_nchw, running_mean, running_var, gamma, beta,
                       conv_w, eps=1e-5):
    """Eval-mode NewBN_VarOnly forward. x_nchw: (N, C, H, W)."""
    N, C, H, W = x_nchw.shape
    HW = H * W
    R = N * C
    n = float(N * H * W)
    ks = int(conv_w.shape[-1])
    pad = (ks - 1) // 2

    f32 = jnp.float32
    rm = running_mean.astype(f32)
    rv = running_var.astype(f32)
    g = gamma.astype(f32)
    b = beta.astype(f32)
    w = conv_w.reshape(ks).astype(f32)

    # --- O(C) per-channel prep (plain JAX glue; negligible vs the big pass) --
    indexmean = jnp.mean(rm) / math.sqrt(n)
    meanmix = indexmean * rm
    index = jax.nn.sigmoid(_conv1d_same(meanmix, w, pad))        # (C,)

    inv_std = lax.rsqrt(rv + eps)
    # out = ((x - mean)*inv_std*gamma + beta) * index
    #     =  x * (gamma*inv_std*index) + (beta - mean*gamma*inv_std)*index
    scale_c = g * inv_std * index                                # (C,)
    shift_c = (b - rm * g * inv_std) * index                     # (C,)

    # Packed per-(n,c)-row [scale, shift]: one small (R, 2) side input — half
    # the lane-padded VMEM and one DMA descriptor/step vs two (R, 1) inputs.
    ss = jnp.stack([scale_c, shift_c], axis=-1)                  # (C, 2)
    row_ss = jnp.broadcast_to(ss[None], (N, C, 2)).reshape(R, 2)

    # NCHW -> (N*C, H*W): free view of the contiguous buffer, dtype untouched.
    x2 = x_nchw.reshape(R, HW)

    bytes_per_elem = x_nchw.dtype.itemsize
    vmem_budget = _vmem_budget_bytes()
    block_rows, block_cols = _pick_tiles(R, HW, bytes_per_elem, vmem_budget)
    grid = (_cdiv(R, block_rows), _cdiv(HW, block_cols))

    # TODO(synk): for HW % 128 != 0 (e.g. 7x7 maps) the last lane column is
    # masked (vst.msk); packing several channels per row and expanding the
    # per-row scale/shift to lanes in-kernel would recover that bandwidth.

    out2 = pl.pallas_call(
        _scale_shift_kernel,
        out_shape=jax.ShapeDtypeStruct((R, HW), x_nchw.dtype),
        grid_spec=pltpu.PrefetchScalarGridSpec(
            num_scalar_prefetch=0,
            grid=grid,
            in_specs=[
                pl.BlockSpec((block_rows, block_cols), lambda i, j: (i, j)),
                pl.BlockSpec((block_rows, 2), lambda i, j: (i, 0)),
            ],
            out_specs=pl.BlockSpec((block_rows, block_cols),
                                   lambda i, j: (i, j)),
        ),
        compiler_params=pltpu.CompilerParams(
            dimension_semantics=("parallel", "parallel"),
            vmem_limit_bytes=int(vmem_budget)),
    )(x2, row_ss)

    return out2.reshape(N, C, H, W)


def reference_eval(x, rm, rv, gamma, beta, conv_w, eps=1e-5):
    """Pure-JAX reference of the PyTorch eval-mode forward (f32 math)."""
    N, C, H, W = x.shape
    n = float(N * H * W)
    ks = int(conv_w.shape[-1])
    pad = (ks - 1) // 2
    w = conv_w.reshape(ks)

    indexmean = jnp.mean(rm) / math.sqrt(n)
    meanmix = indexmean * rm
    mm_pad = jnp.pad(meanmix, (pad, pad))
    conv = jnp.stack([jnp.sum(mm_pad[c:c + ks] * w) for c in range(C)])
    index = jax.nn.sigmoid(conv)

    bn = (x - rm[None, :, None, None]) / jnp.sqrt(rv[None, :, None, None] + eps)
    bn = bn * gamma[None, :, None, None] + beta[None, :, None, None]
    return bn * index[None, :, None, None]


if __name__ == "__main__":
    # Small deterministic example. num_features = 64 -> t = 8 -> ks = 9.
    N, C, H, W = 2, 64, 16, 16
    t = C // 8
    ks = t if t % 2 else t + 1

    key = jax.random.PRNGKey(0)
    kx, kw, km, kv, kg, kb = jax.random.split(key, 6)

    x = jax.random.normal(kx, (N, C, H, W), dtype=jnp.float32)
    # Conv1d(1, 1, ks, bias=False) weight -> shape (1, 1, ks) in torch.
    bound = 1.0 / math.sqrt(ks)
    linearmean_w = jax.random.uniform(kw, (1, 1, ks), minval=-bound,
                                      maxval=bound, dtype=jnp.float32)
    # TODO(synk): `linearvar` and `combine` params exist in __init__ but are
    # unused by forward(); they are intentionally not materialized here.
    running_mean = 0.5 * jax.random.normal(km, (C,), dtype=jnp.float32)
    running_var = jax.random.uniform(kv, (C,), minval=0.5, maxval=1.5,
                                     dtype=jnp.float32)
    gamma = 1.0 + 0.1 * jax.random.normal(kg, (C,), dtype=jnp.float32)
    beta = 0.1 * jax.random.normal(kb, (C,), dtype=jnp.float32)

    # f32 path.
    out = newbn_varonly_eval(x, running_mean, running_var, gamma, beta,
                             linearmean_w)
    out = jax.block_until_ready(out)
    ref = reference_eval(x, running_mean, running_var, gamma, beta,
                         linearmean_w)
    np.testing.assert_allclose(np.asarray(out), np.asarray(ref),
                               rtol=2e-3, atol=2e-3)

    # bf16 I/O path: kernel streams bf16, upcasts to f32 in vregs, stores bf16.
    x_bf16 = x.astype(jnp.bfloat16)
    out_bf16 = jax.block_until_ready(
        newbn_varonly_eval(x_bf16, running_mean, running_var, gamma, beta,
                           linearmean_w))
    assert out_bf16.dtype == jnp.bfloat16
    ref_bf16 = reference_eval(x_bf16.astype(jnp.float32), running_mean,
                              running_var, gamma, beta, linearmean_w)
    np.testing.assert_allclose(np.asarray(out_bf16.astype(jnp.float32)),
                               np.asarray(ref_bf16),
                               rtol=2e-2, atol=3e-2)

    print("KERNEL_OK")
</pallas_src>

<mosaic_0001>
module attributes {stable_mosaic.version = 11 : i64} {
  func.func @_scale_shift_kernel(%arg0: i32, %arg1: i32, %arg2: memref<64x256xf32, #tpu.memory_space<vmem>>, %arg3: memref<64x2xf32, #tpu.memory_space<vmem>>, %arg4: memref<64x256xf32, #tpu.memory_space<vmem>>) attributes {dimension_semantics = [#tpu.dimension_semantics<parallel>, #tpu.dimension_semantics<parallel>], iteration_bounds = array<i64: 2, 1>, scalar_prefetch = 0 : i64, scratch_operands = 0 : i64, tpu.core_type = #tpu.core_type<tc>, window_params = [{transform_indices = @transform_0, window_bounds = array<i64: 64, 256>}, {transform_indices = @transform_1, window_bounds = array<i64: 64, 2>}, {transform_indices = @transform_2, window_bounds = array<i64: 64, 256>}]} {
    %c0 = arith.constant 0 : index
    %c0_0 = arith.constant 0 : index
    %0 = vector.load %arg2[%c0, %c0_0] : memref<64x256xf32, #tpu.memory_space<vmem>>, vector<64x256xf32>
    %c0_1 = arith.constant 0 : index
    %c0_2 = arith.constant 0 : index
    %1 = vector.load %arg3[%c0_1, %c0_2] : memref<64x2xf32, #tpu.memory_space<vmem>>, vector<64x1xf32>
    %c0_3 = arith.constant 0 : index
    %c1 = arith.constant 1 : index
    %2 = vector.load %arg3[%c0_3, %c1] : memref<64x2xf32, #tpu.memory_space<vmem>>, vector<64x1xf32>
    %3 = vector.broadcast %1 : vector<64x1xf32> to vector<64x256xf32>
    %4 = arith.mulf %0, %3 : vector<64x256xf32>
    %5 = vector.broadcast %2 : vector<64x1xf32> to vector<64x256xf32>
    %6 = arith.addf %4, %5 : vector<64x256xf32>
    %c0_4 = arith.constant 0 : index
    %c0_5 = arith.constant 0 : index
    %7 = vector.load %arg4[%c0_4, %c0_5] : memref<64x256xf32, #tpu.memory_space<vmem>>, vector<64x256xf32>
    tpu.vector_store %arg4[%c0_4, %c0_5], %6 {strides = array<i32>} : memref<64x256xf32, #tpu.memory_space<vmem>>, vector<64x256xf32>,
    return
  }
  func.func @transform_0(%arg0: i32, %arg1: i32) -> (i32, i32) {
    %c0_i32 = arith.constant 0 : i32
    return %arg0, %arg1 : i32, i32
  }
  func.func @transform_1(%arg0: i32, %arg1: i32) -> (i32, i32) {
    %c0_i32 = arith.constant 0 : i32
    %c0_i32_0 = arith.constant 0 : i32
    return %arg0, %c0_i32 : i32, i32
  }
  func.func @transform_2(%arg0: i32, %arg1: i32) -> (i32, i32) {
    %c0_i32 = arith.constant 0 : i32
    return %arg0, %arg1 : i32, i32
  }
}

</mosaic_0001>

<bundles_post_ra>
// kernel: newbn_varonly_eval.1
= control target key start
LH: loop header
LB: loop body
LE: loop exit
PB: predicated region body
PF: predicated region fallthrough
CT: control target
= control target key end

     0   :  { %s547_s9 = smov 0   ;;  %s549_s10 = smov 0   ;;  %s623_s0 = inlined_call_operand.vmem [shape: f32[128,256], index: 0, kind: input, shape index: {}]   ;;  %s624_s1 = inlined_call_operand.vmem [shape: f32[128,2], index: 1, kind: input, shape index: {}]   ;;  %s625_s2 = inlined_call_operand.vmem [shape: f32[128,256], index: 2, kind: output, shape index: {}]  }
   0x1   :  { %s551_s11 = smov 0  }
   0x2 LB: > { %s24_s12 = sadd.s32 1, %s524_s10  ;;  %p463_p0 = scmp.ge.s32.totalorder %s528_s11, 1  ;;  %s528_s11 = sphi %s551_s11, %s12_s11   ;;  %s524_s10 = sphi %s549_s10, %s627_s10   ;;  %s520_s9 = sphi %s547_s9, %s626_s9  }
   0x3   : > { %p26_p1 = scmp.ge.s32.totalorder %s24_s12, 2  ;;  %p146_p2 = scmp.lt.s32.totalorder %s528_s11, 3 }
   0x5   : > { %s629_s12 = smov (%p26_p1, %s24_s12), 0  ;;  %p147_p3 = pnand %p463_p0, %p146_p2 }
   0x6   : > { %s464_s13 = sshll.u32 (!%p147_p3), %s520_s9, 3  ;;  %v530_v0 = vmov (!%p147_p3), 0   ;;  %v531_v9 = vmov (!%p147_p3), 1  }
   0x7   : > { %150 = sbr.rel (%p147_p3) target bundleno = 179 (0xb3), region = 28  ;;  %503 = vset.pattern.permute.xlu1 (!%p147_p3), %v530_v0  ;;  %502 = vset.pattern.permute.xlu0 (!%p147_p3), %v530_v0  ;;  %p185_p4 = scmp.lt.s32.totalorder (!%p147_p3), %s464_s13, 15 }
   0xe   : > { %s631_s13 = smov (!%p185_p4, %s464_s13), 15 }
   0xf   : > { %s468_s14 = sshll.u32 %s631_s13, 3  ;;  %s474_s18 = sshll.u32 %s631_s13, 4 }
  0x10   : > { %s199_s17 = scalar_lea.vmem %s624_s1, %s468_s14  ;;  %s575_s21 = scalar_lea.vmem %s623_s0, %s474_s18 }
  0x11   : > { %v231_v1 = vld [vmem:[%s199_s17 + $0x10] sm:$0xff]  ;;  %v229_v2 = vld [vmem:[%s199_s17] sm:$0xff]  ;;  %v232_v3 = vld [vmem:[%s199_s17 + $0x18] sm:$0xff]  ;;  %s585_s24 = scalar_lea.vmem %s625_s2, %s474_s18 }
  0x12   : > { %249 = vperm.xlu1 %503, %v231_v1   ;;  %239 = vperm.xlu0 %502, %v229_v2   ;;  %v230_v4 = vld [vmem:[%s199_s17 + $0x8] sm:$0xff]  ;;  %v233_v6 = vld [vmem:[%s199_s17 + $0x20] sm:$0xff]  ;;  %v236_v7 = vld [vmem:[%s199_s17 + $0x38] sm:$0xff] }
  0x13   : > { %v234_v5 = vld [vmem:[%s199_s17 + $0x28] sm:$0xff]  ;;  %v235_v8 = vld [vmem:[%s199_s17 + $0x30] sm:$0xff]  ;;  %v213_v16 = vld [vmem:[%s575_s21] sm:$0xff] }
  0x14   : > { %v214_v19 = vld [vmem:[%s575_s21 + $0x8] sm:$0xff]  ;;  %v215_v20 = vld [vmem:[%s575_s21 + $0x10] sm:$0xff]  ;;  %v216_v21 = vld [vmem:[%s575_s21 + $0x18] sm:$0xff] }
  0x15   : > { %v217_v22 = vld [vmem:[%s575_s21 + $0x20] sm:$0xff]  ;;  %v218_v27 = vld [vmem:[%s575_s21 + $0x28] sm:$0xff]  ;;  %v219_v28 = vld [vmem:[%s575_s21 + $0x30] sm:$0xff] }
  0x16   : > { %254 = vperm.xlu1 %503, %v232_v3   ;;  %244 = vperm.xlu0 %502, %v230_v4   ;;  %v220_v29 = vld [vmem:[%s575_s21 + $0x38] sm:$0xff]  ;;  %v223_v40 = vld [vmem:[%s575_s21 + $0x50] sm:$0xff]  ;;  %v221_v42 = vld [vmem:[%s575_s21 + $0x40] sm:$0xff] }
  0x17   : > { %v224_v41 = vld [vmem:[%s575_s21 + $0x58] sm:$0xff]  ;;  %v222_v43 = vld [vmem:[%s575_s21 + $0x48] sm:$0xff]  ;;  %v227_v54 = vld [vmem:[%s575_s21 + $0x70] sm:$0xff] }
  0x18   : > { %v228_v55 = vld [vmem:[%s575_s21 + $0x78] sm:$0xff]  ;;  %v225_v56 = vld [vmem:[%s575_s21 + $0x60] sm:$0xff]  ;;  %v226_v57 = vld [vmem:[%s575_s21 + $0x68] sm:$0xff] }
  0x1a   : > { %264 = vperm.xlu1 %503, %v234_v5   ;;  %259 = vperm.xlu0 %502, %v233_v6  }
  0x1e   : > { %274 = vperm.xlu1 %503, %v236_v7   ;;  %269 = vperm.xlu0 %502, %v235_v8  }
  0x22   : > { %505 = vset.pattern.permute.xlu1 %v531_v9  ;;  %504 = vset.pattern.permute.xlu0 %v531_v9 }
  0x23   : > { %298 = vperm.xlu1 %505, %v230_v4   ;;  %294 = vperm.xlu0 %504, %v229_v2  }
  0x27   : > { %302 = vperm.xlu1 %505, %v231_v1   ;;  %306 = vperm.xlu0 %504, %v232_v3  }
  0x2b   : > { %310 = vperm.xlu1 %505, %v233_v6   ;;  %314 = vperm.xlu0 %504, %v234_v5  }
  0x2f   : > { %318 = vperm.xlu1 %505, %v235_v8   ;;  %322 = vperm.xlu0 %504, %v236_v7  }
  0x91   : > { %v250_v10 = vpop.permute.xlu1 %249  ;;  %v240_v11 = vpop.permute.xlu0 %239 }
  0x92   : > { %v277_v23 = vmul.f32 %v240_v11, %v213_v16  ;;  %v278_v24 = vmul.f32 %v240_v11, %v214_v19  ;;  %v281_v36 = vmul.f32 %v250_v10, %v217_v22  ;;  %v282_v37 = vmul.f32 %v250_v10, %v218_v27 }
  0x95   : > { %v255_v12 = vpop.permute.xlu1 %254  ;;  %v245_v13 = vpop.permute.xlu0 %244 }
  0x96   : > { %v279_v25 = vmul.f32 %v245_v13, %v215_v20  ;;  %v280_v26 = vmul.f32 %v245_v13, %v216_v21  ;;  %v283_v38 = vmul.f32 %v255_v12, %v219_v28  ;;  %v284_v39 = vmul.f32 %v255_v12, %v220_v29 }
  0x99   : > { %v265_v14 = vpop.permute.xlu1 %264  ;;  %v260_v15 = vpop.permute.xlu0 %259 }
  0x9a   : > { %v287_v50 = vmul.f32 %v265_v14, %v223_v40  ;;  %v288_v51 = vmul.f32 %v265_v14, %v224_v41  ;;  %v285_v52 = vmul.f32 %v260_v15, %v221_v42  ;;  %v286_v53 = vmul.f32 %v260_v15, %v222_v43 }
  0x9d   : > { %v275_v17 = vpop.permute.xlu1 %274  ;;  %v270_v18 = vpop.permute.xlu0 %269 }
  0x9e   : > { %v291_v0 = vmul.f32 %v275_v17, %v227_v54  ;;  %v292_v1 = vmul.f32 %v275_v17, %v228_v55  ;;  %v289_v2 = vmul.f32 %v270_v18, %v225_v56  ;;  %v290_v3 = vmul.f32 %v270_v18, %v226_v57 }
  0xa2   : > { %v299_v30 = vpop.permute.xlu1 %298  ;;  %v295_v31 = vpop.permute.xlu0 %294 }
  0xa3   : > { %v327_v32 = vadd.f32 %v299_v30, %v279_v25  ;;  %v328_v33 = vadd.f32 %v299_v30, %v280_v26  ;;  %v325_v34 = vadd.f32 %v295_v31, %v277_v23  ;;  %v326_v35 = vadd.f32 %v295_v31, %v278_v24 }
  0xa5   : > { %343 = vst [vmem:[%s585_s24 + $0x10] sm:$0xff] %v327_v32  ;;  %344 = vst [vmem:[%s585_s24 + $0x18] sm:$0xff] %v328_v33 }
  0xa6   : > { %341 = vst [vmem:[%s585_s24] sm:$0xff] %v325_v34  ;;  %342 = vst [vmem:[%s585_s24 + $0x8] sm:$0xff] %v326_v35  ;;  %v303_v44 = vpop.permute.xlu1 %302  ;;  %v307_v45 = vpop.permute.xlu0 %306 }
  0xa7   : > { %v329_v46 = vadd.f32 %v303_v44, %v281_v36  ;;  %v330_v47 = vadd.f32 %v303_v44, %v282_v37  ;;  %v331_v48 = vadd.f32 %v307_v45, %v283_v38  ;;  %v332_v49 = vadd.f32 %v307_v45, %v284_v39 }
  0xa9   : > { %345 = vst [vmem:[%s585_s24 + $0x20] sm:$0xff] %v329_v46  ;;  %346 = vst [vmem:[%s585_s24 + $0x28] sm:$0xff] %v330_v47 }
  0xaa   : > { %347 = vst [vmem:[%s585_s24 + $0x30] sm:$0xff] %v331_v48  ;;  %348 = vst [vmem:[%s585_s24 + $0x38] sm:$0xff] %v332_v49  ;;  %v311_v58 = vpop.permute.xlu1 %310  ;;  %v315_v59 = vpop.permute.xlu0 %314 }
  0xab   : > { %v333_v60 = vadd.f32 %v311_v58, %v285_v52  ;;  %v334_v61 = vadd.f32 %v311_v58, %v286_v53  ;;  %v335_v62 = vadd.f32 %v315_v59, %v287_v50  ;;  %v336_v63 = vadd.f32 %v315_v59, %v288_v51 }
  0xad   : > { %349 = vst [vmem:[%s585_s24 + $0x40] sm:$0xff] %v333_v60  ;;  %350 = vst [vmem:[%s585_s24 + $0x48] sm:$0xff] %v334_v61 }
  0xae   : > { %351 = vst [vmem:[%s585_s24 + $0x50] sm:$0xff] %v335_v62  ;;  %352 = vst [vmem:[%s585_s24 + $0x58] sm:$0xff] %v336_v63  ;;  %v319_v4 = vpop.permute.xlu1 %318  ;;  %v323_v5 = vpop.permute.xlu0 %322 }
  0xaf   : > { %v337_v6 = vadd.f32 %v319_v4, %v289_v2  ;;  %v338_v7 = vadd.f32 %v319_v4, %v290_v3  ;;  %v339_v8 = vadd.f32 %v323_v5, %v291_v0  ;;  %v340_v9 = vadd.f32 %v323_v5, %v292_v1 }
  0xb1   : > { %353 = vst [vmem:[%s585_s24 + $0x60] sm:$0xff] %v337_v6  ;;  %354 = vst [vmem:[%s585_s24 + $0x68] sm:$0xff] %v338_v7 }
  0xb2   : > { %355 = vst [vmem:[%s585_s24 + $0x70] sm:$0xff] %v339_v8  ;;  %356 = vst [vmem:[%s585_s24 + $0x78] sm:$0xff] %v340_v9 }
  0xb3 PF: > { %s12_s11 = sadd.s32 1, %s528_s11   ;;  %s626_s9 = smov %s524_s10 }
  0xb4   : > { %p9_p5 = scmp.ge.s32.totalorder %s12_s11, 4   ;;  %s627_s10 = smov %s629_s12 }
  0xb6   :  { %11 = sbr.rel (!%p9_p5) target bundleno = 2 (0x2), region = 61 }

</bundles_post_ra>
